<compile_context>
chip_gen: v5e
topology: v5e:2x2
jax: 0.10.0
libtpu: 0.0.40
codegen_flags: <defaults>
</compile_context>

<pallas_src>
import functools

import jax
import jax.numpy as jnp
from jax import lax
from jax.experimental import pallas as pl
from jax.experimental.pallas import tpu as pltpu

EPS = 1e-5
_VMEM_LIMIT = 32 * 1024 * 1024          # safe on v5e/v6e (128 MiB) and v7x (64 MiB)
_RESIDENT_THRESHOLD = 4 * 1024 * 1024   # whole-tensor-in-VMEM fast path cutoff
_BLOCK_BUDGET = 4 * 1024 * 1024         # per streaming block (double-buffered in+out)
_TS_CAP = 8192                          # spatial tile cap (v7x HBM is fast)


# ---------------------------------------------------------------------------
# Kernels
# ---------------------------------------------------------------------------
def _resident_kernel(x_ref, o_ref, *, inv_count, eps):
    """Whole (N, C, S) slab resident in VMEM; two-pass stats + normalize."""
    x = x_ref[...].astype(jnp.float32)                          # (N, C, S)
    mean = jnp.sum(jnp.sum(x, axis=0), axis=-1, keepdims=True) * inv_count  # (C, 1)
    xc = x - mean
    var = jnp.sum(jnp.sum(xc * xc, axis=0), axis=-1, keepdims=True) * inv_count
    o_ref[...] = (xc * lax.rsqrt(var + eps)).astype(o_ref.dtype)


def _stats_kernel(x_ref, part_ref, *, ts, s_total, need_mask):
    """Per-tile partial (sum, sumsq) per channel.  Tail columns masked."""
    x = x_ref[...].astype(jnp.float32)                          # (N, C, TS)
    if need_mask:
        col = lax.broadcasted_iota(jnp.int32, x.shape, 2) + pl.program_id(0) * ts
        x = jnp.where(col < s_total, x, 0.0)
    s_nc = jnp.sum(x, axis=0)                                   # (C, TS)  VALU
    sq_nc = jnp.sum(x * x, axis=0)                              # (C, TS)  VALU
    part_ref[0, 0] = jnp.sum(s_nc, axis=-1, keepdims=True)      # (C, 1)
    part_ref[0, 1] = jnp.sum(sq_nc, axis=-1, keepdims=True)     # (C, 1)


def _norm_kernel(stats_ref, x_ref, o_ref):
    """Streaming normalize: y = (x - mean) * inv_std."""
    mean = stats_ref[0]                                         # (C, 1)
    inv_std = stats_ref[1]                                      # (C, 1)
    x = x_ref[...].astype(jnp.float32)                          # (N, C, TS)
    o_ref[...] = ((x - mean) * inv_std).astype(o_ref.dtype)


# ---------------------------------------------------------------------------
# Tiling
# ---------------------------------------------------------------------------
def _pick_tile(s, n, c):
    """Lane-dense spatial tile (multiple of 128), capped and VMEM-budgeted."""
    elem = 4  # accumulate in f32
    s_pad = pl.cdiv(s, 128) * 128
    budget_ts = (_BLOCK_BUDGET // (n * c * elem) // 128) * 128
    max_ts = max(128, min(s_pad, _TS_CAP, budget_ts))
    # Prefer a tile that divides S exactly (no tail masking), as long as it is
    # not much smaller than the cap; otherwise use max_ts and mask the tail.
    lo = max(128, max_ts // 2)
    for ts in range(max_ts, lo - 1, -128):
        if s % ts == 0:
            return ts, False
    return max_ts, True


# ---------------------------------------------------------------------------
# Wrapper
# ---------------------------------------------------------------------------
def batchnorm3d(x, eps=EPS, resident_threshold_bytes=_RESIDENT_THRESHOLD):
    """x: (N, C, D, H, W) -> training-mode BatchNorm3d (no affine)."""
    n, c, d, h, w = x.shape
    s = d * h * w
    x3 = x.reshape(n, c, s)                 # free view (NCDHW is contiguous)
    inv_count = 1.0 / float(n * s)
    nbytes = n * c * s * x.dtype.itemsize

    # ---- Fast path: whole tensor resident in VMEM, single pass over HBM ----
    if nbytes <= resident_threshold_bytes:
        out3 = pl.pallas_call(
            functools.partial(_resident_kernel, inv_count=inv_count, eps=eps),
            out_shape=jax.ShapeDtypeStruct((n, c, s), x.dtype),
            grid=(1,),
            in_specs=[pl.BlockSpec((n, c, s), lambda i: (0, 0, 0))],
            out_specs=pl.BlockSpec((n, c, s), lambda i: (0, 0, 0)),
            compiler_params=pltpu.CompilerParams(
                dimension_semantics=("arbitrary",),
                vmem_limit_bytes=_VMEM_LIMIT),
            cost_estimate=pl.CostEstimate(
                flops=5 * n * c * s, transcendentals=c,
                bytes_accessed=2 * nbytes),
        )(x3)
        return out3.reshape(n, c, d, h, w)

    # ---- Streaming path: stats kernel -> tiny XLA reduce -> normalize ------
    ts, need_mask = _pick_tile(s, n, c)
    n_tiles = pl.cdiv(s, ts)

    partials = pl.pallas_call(
        functools.partial(_stats_kernel, ts=ts, s_total=s, need_mask=need_mask),
        out_shape=jax.ShapeDtypeStruct((n_tiles, 2, c, 1), jnp.float32),
        grid=(n_tiles,),
        in_specs=[pl.BlockSpec((n, c, ts), lambda t: (0, 0, t))],
        out_specs=pl.BlockSpec((1, 2, c, 1), lambda t: (t, 0, 0, 0)),
        compiler_params=pltpu.CompilerParams(
            dimension_semantics=("parallel",),       # megacore-safe on v7x
            vmem_limit_bytes=_VMEM_LIMIT),
        cost_estimate=pl.CostEstimate(
            flops=3 * n * c * s, transcendentals=0, bytes_accessed=nbytes),
    )(x3)

    sums = jnp.sum(partials, axis=0)                 # (2, C, 1) f32, tiny
    mean = sums[0] * inv_count                       # (C, 1)
    # TODO(synk): E[x^2] - mean^2 in f32 can cancel for offset-heavy inputs; a
    # shifted / Welford merge of the per-tile partials would be more robust.
    var = jnp.maximum(sums[1] * inv_count - mean * mean, 0.0)
    inv_std = lax.rsqrt(var + eps)
    stats = jnp.stack([mean, inv_std], axis=0)       # (2, C, 1)

    out3 = pl.pallas_call(
        _norm_kernel,
        out_shape=jax.ShapeDtypeStruct((n, c, s), x.dtype),
        grid=(n_tiles,),
        in_specs=[pl.BlockSpec((2, c, 1), lambda t: (0, 0, 0)),   # resident stats
                  pl.BlockSpec((n, c, ts), lambda t: (0, 0, t))],
        out_specs=pl.BlockSpec((n, c, ts), lambda t: (0, 0, t)),
        compiler_params=pltpu.CompilerParams(
            dimension_semantics=("parallel",),       # megacore-safe on v7x
            vmem_limit_bytes=_VMEM_LIMIT),
        cost_estimate=pl.CostEstimate(
            flops=2 * n * c * s, transcendentals=0, bytes_accessed=2 * nbytes),
    )(stats, x3)

    return out3.reshape(n, c, d, h, w)


# ---------------------------------------------------------------------------
# Test
# ---------------------------------------------------------------------------
if __name__ == "__main__":
    def reference(x, eps=EPS):
        mean = jnp.mean(x, axis=(0, 2, 3, 4), keepdims=True)
        var = jnp.mean((x - mean) ** 2, axis=(0, 2, 3, 4), keepdims=True)
        return (x - mean) / jnp.sqrt(var + eps)

    key = jax.random.PRNGKey(0)
    k1, k2 = jax.random.split(key)
    N, C = 2, 100   # num_features=100 is fixed by the module

    # Case 1: small tensor -> VMEM-resident single-pass fast path.
    x1 = jax.random.normal(k1, (N, C, 4, 8, 8), dtype=jnp.float32) * 2.0 + 0.5
    out1 = jax.block_until_ready(batchnorm3d(x1))
    ref1 = reference(x1)
    assert out1.shape == x1.shape and out1.dtype == x1.dtype
    assert jnp.allclose(out1, ref1, atol=2e-4, rtol=2e-4), "resident path mismatch"

    # Case 2: force the streaming two-pass path (stats + normalize kernels).
    out2 = jax.block_until_ready(batchnorm3d(x1, resident_threshold_bytes=0))
    assert jnp.allclose(out2, ref1, atol=2e-4, rtol=2e-4), "streaming path mismatch"

    # Case 3: streaming path with a spatial extent that is not a multiple of
    # 128 (exercises the masked tail tile).
    x3 = jax.random.normal(k2, (N, C, 3, 5, 7), dtype=jnp.float32) * 1.5 - 0.3
    out3 = jax.block_until_ready(batchnorm3d(x3, resident_threshold_bytes=0))
    assert jnp.allclose(out3, reference(x3), atol=2e-4, rtol=2e-4), "masked tail mismatch"

    print("KERNEL_OK")
</pallas_src>

<mosaic_0001>
module attributes {stable_mosaic.version = 11 : i64} {
  func.func @_resident_kernel(%arg0: i32, %arg1: memref<2x100x256xf32, #tpu.memory_space<vmem>>, %arg2: memref<2x100x256xf32, #tpu.memory_space<vmem>>) attributes {dimension_semantics = [#tpu.dimension_semantics<arbitrary>], iteration_bounds = array<i64: 1>, scalar_prefetch = 0 : i64, scratch_operands = 0 : i64, tpu.core_type = #tpu.core_type<tc>, window_params = [{pipeline_mode = #tpu.pipeline_mode<synchronous>, transform_indices = @transform_0, window_bounds = array<i64: 2, 100, 256>}, {pipeline_mode = #tpu.pipeline_mode<synchronous>, transform_indices = @transform_1, window_bounds = array<i64: 2, 100, 256>}]} {
    %c0 = arith.constant 0 : index
    %c0_0 = arith.constant 0 : index
    %c0_1 = arith.constant 0 : index
    %0 = vector.load %arg1[%c0, %c0_0, %c0_1] : memref<2x100x256xf32, #tpu.memory_space<vmem>>, vector<2x100x256xf32>
    %cst = arith.constant dense<0.000000e+00> : vector<100x256xf32>
    %1 = vector.multi_reduction <add>, %0, %cst [0] : vector<2x100x256xf32> to vector<100x256xf32>
    %cst_2 = arith.constant dense<0.000000e+00> : vector<100xf32>
    %2 = vector.multi_reduction <add>, %1, %cst_2 [1] : vector<100x256xf32> to vector<100xf32>
    %3 = vector.shape_cast %2 : vector<100xf32> to vector<100x1xf32>
    %cst_3 = arith.constant 0.001953125 : f32
    %4 = vector.broadcast %cst_3 : f32 to vector<100x1xf32>
    %5 = arith.mulf %3, %4 : vector<100x1xf32>
    %6 = vector.shape_cast %5 : vector<100x1xf32> to vector<1x100x1xf32>
    %7 = vector.broadcast %6 : vector<1x100x1xf32> to vector<2x100x256xf32>
    %8 = arith.subf %0, %7 : vector<2x100x256xf32>
    %9 = arith.mulf %8, %8 : vector<2x100x256xf32>
    %cst_4 = arith.constant dense<0.000000e+00> : vector<100x256xf32>
    %10 = vector.multi_reduction <add>, %9, %cst_4 [0] : vector<2x100x256xf32> to vector<100x256xf32>
    %cst_5 = arith.constant dense<0.000000e+00> : vector<100xf32>
    %11 = vector.multi_reduction <add>, %10, %cst_5 [1] : vector<100x256xf32> to vector<100xf32>
    %12 = vector.shape_cast %11 : vector<100xf32> to vector<100x1xf32>
    %cst_6 = arith.constant 0.001953125 : f32
    %13 = vector.broadcast %cst_6 : f32 to vector<100x1xf32>
    %14 = arith.mulf %12, %13 : vector<100x1xf32>
    %cst_7 = arith.constant 9.99999974E-6 : f32
    %15 = vector.broadcast %cst_7 : f32 to vector<100x1xf32>
    %16 = arith.addf %14, %15 : vector<100x1xf32>
    %17 = math.rsqrt %16 : vector<100x1xf32>
    %18 = vector.shape_cast %17 : vector<100x1xf32> to vector<1x100x1xf32>
    %19 = vector.broadcast %18 : vector<1x100x1xf32> to vector<2x100x256xf32>
    %20 = arith.mulf %8, %19 : vector<2x100x256xf32>
    %c0_8 = arith.constant 0 : index
    %c0_9 = arith.constant 0 : index
    %c0_10 = arith.constant 0 : index
    %21 = vector.load %arg2[%c0_8, %c0_9, %c0_10] : memref<2x100x256xf32, #tpu.memory_space<vmem>>, vector<2x100x256xf32>
    tpu.vector_store %arg2[%c0_8, %c0_9, %c0_10], %20 {strides = array<i32>} : memref<2x100x256xf32, #tpu.memory_space<vmem>>, vector<2x100x256xf32>,
    return
  }
  func.func @transform_0(%arg0: i32) -> (i32, i32, i32) {
    %c0_i32 = arith.constant 0 : i32
    %c0_i32_0 = arith.constant 0 : i32
    %c0_i32_1 = arith.constant 0 : i32
    %c0_i32_2 = arith.constant 0 : i32
    return %c0_i32, %c0_i32_0, %c0_i32_1 : i32, i32, i32
  }
  func.func @transform_1(%arg0: i32) -> (i32, i32, i32) {
    %c0_i32 = arith.constant 0 : i32
    %c0_i32_0 = arith.constant 0 : i32
    %c0_i32_1 = arith.constant 0 : i32
    %c0_i32_2 = arith.constant 0 : i32
    return %c0_i32, %c0_i32_0, %c0_i32_1 : i32, i32, i32
  }
}

</mosaic_0001>

<bundles_post_ra>
// kernel: tpu_custom_call.1
= control target key start
LH: loop header
LB: loop body
LE: loop exit
PB: predicated region body
PF: predicated region fallthrough
CT: control target
= control target key end

     0   :  { %vm84_vm0 = vcmask 1043456   ;;  %s1543_s0 = inlined_call_operand.vmem [shape: f32[2,100,256], index: 0, kind: input, shape index: {}]   ;;  %s1544_s1 = inlined_call_operand.vmem [shape: f32[2,100,256], index: 1, kind: output, shape index: {}]  }
   0x1   :  { %v623_v0 = vld [vmem:[%s1543_s0 + $0x30] sm:$0xff]  ;;  %v628_v1 = vld [vmem:[%s1543_s0 + $0x38] sm:$0xff]  ;;  %v633_v2 = vld [vmem:[%s1543_s0 + $0x100] sm:$0xff] }
   0x2   :  { %v638_v3 = vld [vmem:[%s1543_s0 + $0x108] sm:$0xff]  ;;  %v66_v4 = vadd.f32 %v633_v2, %v623_v0  ;;  %v645_v5 = vld [vmem:[%s1543_s0 + $0x10] sm:$0xff]  ;;  %v650_v6 = vld [vmem:[%s1543_s0 + $0x18] sm:$0xff] }
   0x3   :  { %v67_v7 = vadd.f32 %v638_v3, %v628_v1  ;;  %v657_v8 = vld [vmem:[%s1543_s0 + $0xe0] sm:$0xff]  ;;  %v662_v9 = vld [vmem:[%s1543_s0 + $0xe8] sm:$0xff]  ;;  %v681_v14 = vld [vmem:[%s1543_s0 + $0xd0] sm:$0xff] }
   0x4   :  { %v667_v10 = vld [vmem:[%s1543_s0] sm:$0xff]  ;;  %v62_v11 = vadd.f32 %v657_v8, %v645_v5  ;;  %v63_v12 = vadd.f32 %v662_v9, %v650_v6  ;;  %v676_v13 = vld [vmem:[%s1543_s0 + $0x8] sm:$0xff]  ;;  %v686_v15 = vld [vmem:[%s1543_s0 + $0xd8] sm:$0xff] }
   0x5   :  { %v100_v16 = vadd.f32 %v67_v7, %v66_v4  ;;  %v60_v17 = vadd.f32 %v681_v14, %v667_v10  ;;  %v61_v18 = vadd.f32 %v686_v15, %v676_v13  ;;  %v695_v19 = vld [vmem:[%s1543_s0 + $0x40] sm:$0xff]  ;;  %v700_v20 = vld [vmem:[%s1543_s0 + $0x48] sm:$0xff]  ;;  %v705_v21 = vld [vmem:[%s1543_s0 + $0x110] sm:$0xff] }
   0x6   :  { %v94_v22 = vadd.f32 %v63_v12, %v62_v11  ;;  %v710_v23 = vld [vmem:[%s1543_s0 + $0x118] sm:$0xff]  ;;  %v715_v24 = vld [vmem:[%s1543_s0 + $0x20] sm:$0xff]  ;;  %v720_v25 = vld [vmem:[%s1543_s0 + $0x28] sm:$0xff]  ;;  %v68_v27 = vadd.f32 %v705_v21, %v695_v19 }
   0x7   :  { %101 = vadd.xlane.f32.xlu2 %v100_v16  ;;  %v91_v26 = vadd.f32 %v61_v18, %v60_v17  ;;  %v69_v28 = vadd.f32 %v710_v23, %v700_v20  ;;  %v729_v29 = vld [vmem:[%s1543_s0 + $0xf0] sm:$0xff]  ;;  %v734_v30 = vld [vmem:[%s1543_s0 + $0xf8] sm:$0xff]  ;;  %v739_v31 = vld [vmem:[%s1543_s0 + $0xc0] sm:$0xf] }
   0x8   :  { %95 = vadd.xlane.f32.xlu1 %v94_v22  ;;  %v64_v32 = vadd.f32 %v729_v29, %v715_v24  ;;  %v65_v33 = vadd.f32 %v734_v30, %v720_v25  ;;  %v748_v34 = vld [vmem:[%s1543_s0 + $0xc8] sm:$0xf]  ;;  %v753_v35 = vld [vmem:[%s1543_s0 + $0x190] sm:$0xf]  ;;  %v758_v36 = vld [vmem:[%s1543_s0 + $0x198] sm:$0xf] }
   0x9   :  { %92 = vadd.xlane.f32.xlu0 %v91_v26  ;;  %v85_v37 = vsel %vm84_vm0, %v739_v31, 0.0  ;;  %v86_v38 = vsel %vm84_vm0, %v753_v35, 0.0  ;;  %v88_v39 = vsel %vm84_vm0, %v748_v34, 0.0  ;;  %v89_v41 = vsel %vm84_vm0, %v758_v36, 0.0  ;;  %v771_v44 = vld [vmem:[%s1543_s0 + $0x70] sm:$0xff]  ;;  %v776_v45 = vld [vmem:[%s1543_s0 + $0x78] sm:$0xff] }
   0xa   :  { %v87_v40 = vadd.f32 %v86_v38, %v85_v37  ;;  %v103_v42 = vadd.f32 %v69_v28, %v68_v27  ;;  %v90_v43 = vadd.f32 %v89_v41, %v88_v39  ;;  %v781_v46 = vld [vmem:[%s1543_s0 + $0x140] sm:$0xff]  ;;  %v97_v47 = vadd.f32 %v65_v33, %v64_v32  ;;  %v787_v49 = vld [vmem:[%s1543_s0 + $0x148] sm:$0xff]  ;;  %v803_v53 = vld [vmem:[%s1543_s0 + $0x130] sm:$0xff] }
   0xb   :  { %v792_v50 = vld [vmem:[%s1543_s0 + $0x60] sm:$0xff]  ;;  %v797_v51 = vld [vmem:[%s1543_s0 + $0x68] sm:$0xff]  ;;  %v808_v54 = vld [vmem:[%s1543_s0 + $0x138] sm:$0xff]  ;;  %v74_v60 = vadd.f32 %v781_v46, %v771_v44  ;;  %v75_v61 = vadd.f32 %v787_v49, %v776_v45 }
   0xc   :  { %v127_v48 = vsel %vm84_vm0, %v87_v40, 0.0  ;;  %v128_v52 = vsel %vm84_vm0, %v90_v43, 0.0  ;;  %v813_v55 = vld [vmem:[%s1543_s0 + $0x50] sm:$0xff]  ;;  %v818_v57 = vld [vmem:[%s1543_s0 + $0x58] sm:$0xff]  ;;  %v823_v58 = vld [vmem:[%s1543_s0 + $0x120] sm:$0xff]  ;;  %v72_v62 = vadd.f32 %v803_v53, %v792_v50  ;;  %v73_v63 = vadd.f32 %v808_v54, %v797_v51 }
   0xd   :  { %v129_v56 = vadd.f32 %v128_v52, %v127_v48  ;;  %v828_v59 = vld [vmem:[%s1543_s0 + $0x128] sm:$0xff]  ;;  %v70_v4 = vadd.f32 %v823_v58, %v813_v55  ;;  %v112_v11 = vadd.f32 %v75_v61, %v74_v60  ;;  %v845_v12 = vld [vmem:[%s1543_s0 + $0xa0] sm:$0xff]  ;;  %v855_v17 = vld [vmem:[%s1543_s0 + $0x170] sm:$0xff] }
   0xe   :  { %v71_v7 = vadd.f32 %v828_v59, %v818_v57  ;;  %v850_v16 = vld [vmem:[%s1543_s0 + $0xa8] sm:$0xff]  ;;  %v109_v18 = vadd.f32 %v73_v63, %v72_v62  ;;  %v860_v22 = vld [vmem:[%s1543_s0 + $0x178] sm:$0xff]  ;;  %v865_v26 = vld [vmem:[%s1543_s0 + $0x90] sm:$0xff]  ;;  %v80_v41 = vadd.f32 %v855_v17, %v845_v12 }
   0xf   :  { %104 = vadd.xlane.f32.xlu2 %v103_v42  ;;  %v870_v27 = vld [vmem:[%s1543_s0 + $0x98] sm:$0xff]  ;;  %v875_v32 = vld [vmem:[%s1543_s0 + $0x160] sm:$0xff]  ;;  %v880_v33 = vld [vmem:[%s1543_s0 + $0x168] sm:$0xff]  ;;  %v81_v42 = vadd.f32 %v860_v22, %v850_v16 }
  0x10   :  { %98 = vadd.xlane.f32.xlu1 %v97_v47  ;;  %v106_v28 = vadd.f32 %v71_v7, %v70_v4  ;;  %v885_v37 = vld [vmem:[%s1543_s0 + $0x80] sm:$0xff]  ;;  %v890_v38 = vld [vmem:[%s1543_s0 + $0x88] sm:$0xff]  ;;  %v895_v39 = vld [vmem:[%s1543_s0 + $0x150] sm:$0xff]  ;;  %v78_v43 = vadd.f32 %v875_v32, %v865_v26  ;;  %v79_v47 = vadd.f32 %v880_v33, %v870_v27 }
  0x11   :  { %130 = vadd.xlane.f32.xlu0 %v129_v56  ;;  %v900_v40 = vld [vmem:[%s1543_s0 + $0x158] sm:$0xff]  ;;  %v76_v48 = vadd.f32 %v895_v39, %v885_v37  ;;  %v121_v56 = vadd.f32 %v81_v42, %v80_v41  ;;  %v917_v62 = vld [vmem:[%s1543_s0 + $0xb0] sm:$0xff]  ;;  %v927_v4 = vld [vmem:[%s1543_s0 + $0x180] sm:$0xff] }
  0x12   :  { %1565 = vst [vmem:[#allocation2_spill] sm:$0xff] %v900_v40  ;;  %v77_v52 = vadd.f32 %v900_v40, %v890_v38  ;;  %v118_v60 = vadd.f32 %v79_v47, %v78_v43  ;;  %v922_v63 = vld [vmem:[%s1543_s0 + $0xb8] sm:$0xff]  ;;  %v932_v7 = vld [vmem:[%s1543_s0 + $0x188] sm:$0xff] }
  0x13   :  { %1566 = vst [vmem:[#allocation3_spill] sm:$0xff] %v927_v4 }
  0x14   :  { %v115_v61 = vadd.f32 %v77_v52, %v76_v48  ;;  %1567 = vst [vmem:[#allocation4_spill] sm:$0xff] %v932_v7 }
  0x17   :  { %113 = vadd.xlane.f32.xlu2 %v112_v11  ;;  %v82_v11 = vadd.f32 %v927_v4, %v917_v62 }
  0x18   :  { %110 = vadd.xlane.f32.xlu1 %v109_v18  ;;  %v83_v18 = vadd.f32 %v932_v7, %v922_v63 }
  0x19   :  { %107 = vadd.xlane.f32.xlu0 %v106_v28 }
  0x1a   :  { %v124_v28 = vadd.f32 %v83_v18, %v82_v11 }
  0x1f   :  { %122 = vadd.xlane.f32.xlu2 %v121_v56 }
  0x20   :  { %119 = vadd.xlane.f32.xlu1 %v118_v60 }
  0x21   :  { %116 = vadd.xlane.f32.xlu0 %v115_v61 }
  0x29   :  { %125 = vadd.xlane.f32.xlu0 %v124_v28 }
  0x7a   :  { %v102_v41 = vpop.xlane.xlu2 %101 }
  0x7b   :  { %v135_v42 = vmul.f32 0.001953125, %v102_v41  ;;  %v96_v43 = vpop.xlane.xlu1 %95 }
  0x7c   :  { %v133_v47 = vmul.f32 0.001953125, %v96_v43  ;;  %v93_v48 = vpop.xlane.xlu0 %92 }
  0x7d   :  { %v132_v52 = vmul.f32 0.001953125, %v93_v48  ;;  %v939_v40 = vsub.f32 %v623_v0, %v135_v42  ;;  %v942_v56 = vsub.f32 %v628_v1, %v135_v42  ;;  %v945_v60 = vsub.f32 %v633_v2, %v135_v42 }
  0x7e   :  { %v948_v61 = vsub.f32 %v645_v5, %v133_v47  ;;  %v951_v11 = vsub.f32 %v650_v6, %v133_v47  ;;  %v954_v18 = vsub.f32 %v657_v8, %v133_v47  ;;  %v957_v28 = vsub.f32 %v662_v9, %v133_v47 }
  0x7f   :  { %v960_v0 = vsub.f32 %v667_v10, %v132_v52  ;;  %v963_v1 = vsub.f32 %v676_v13, %v132_v52  ;;  %v966_v2 = vsub.f32 %v681_v14, %v132_v52  ;;  %v969_v5 = vsub.f32 %v686_v15, %v132_v52 }
  0x80   :  { %1568 = vst [vmem:[#allocation5_spill] sm:$0xff] %v948_v61  ;;  %v199_v6 = vmul.f32 %v948_v61, %v948_v61  ;;  %v200_v8 = vmul.f32 %v951_v11, %v951_v11  ;;  %v225_v9 = vmul.f32 %v954_v18, %v954_v18  ;;  %v226_v10 = vmul.f32 %v957_v28, %v957_v28 }
  0x81   :  { %1569 = vst [vmem:[#allocation6_spill] sm:$0xff] %v951_v11  ;;  %v197_v13 = vmul.f32 %v960_v0, %v960_v0  ;;  %v198_v14 = vmul.f32 %v963_v1, %v963_v1  ;;  %v223_v15 = vmul.f32 %v966_v2, %v966_v2  ;;  %v224_v41 = vmul.f32 %v969_v5, %v969_v5 }
  0x82   :  { %1570 = vst [vmem:[#allocation7_spill] sm:$0xff] %v954_v18  ;;  %v105_v43 = vpop.xlane.xlu2 %104  ;;  %v251_v47 = vadd.f32 %v225_v9, %v199_v6  ;;  %v252_v48 = vadd.f32 %v226_v10, %v200_v8  ;;  %v988_v52 = vsub.f32 %v638_v3, %v135_v42  ;;  %v229_v6 = vmul.f32 %v945_v60, %v945_v60 }
  0x83   :  { %1571 = vst [vmem:[#allocation8_spill] sm:$0xff] %v957_v28  ;;  %v203_v28 = vmul.f32 %v939_v40, %v939_v40  ;;  %v136_v18 = vmul.f32 0.001953125, %v105_v43  ;;  %v249_v11 = vadd.f32 %v223_v15, %v197_v13  ;;  %v250_v61 = vadd.f32 %v224_v41, %v198_v14 }
  0x84   :  { %1572 = vst [vmem:[#allocation9_spill] sm:$0xff] %v960_v0  ;;  %v99_v0 = vpop.xlane.xlu1 %98  ;;  %v131_v7 = vpop.xlane.xlu0 %130  ;;  %v282_v4 = vadd.f32 %v252_v48, %v251_v47  ;;  %v230_v3 = vmul.f32 %v988_v52, %v988_v52 }
  0x85   :  { %1573 = vst [vmem:[#allocation10_spill] sm:$0xff] %v963_v1  ;;  %v204_v1 = vmul.f32 %v942_v56, %v942_v56  ;;  %v144_v42 = vmul.f32 0.001953125, %v131_v7  ;;  %v279_v8 = vadd.f32 %v250_v61, %v249_v11  ;;  %v999_v9 = vsub.f32 %v695_v19, %v136_v18 }
  0x86   :  { %1574 = vst [vmem:[#allocation11_spill] sm:$0xff] %v966_v2  ;;  %v134_v2 = vmul.f32 0.001953125, %v99_v0  ;;  %v1002_v10 = vsub.f32 %v700_v20, %v136_v18  ;;  %283 = vadd.xlane.f32.xlu2 %v282_v4  ;;  %v1005_v13 = vsub.f32 %v705_v21, %v136_v18  ;;  %v1008_v0 = vsub.f32 %v710_v23, %v136_v18 }
  0x87   :  { %v1017_v7 = vsub.f32 %v739_v31, %v144_v42  ;;  %v1020_v19 = vsub.f32 %v748_v34, %v144_v42  ;;  %v1023_v20 = vsub.f32 %v753_v35, %v144_v42  ;;  %v1026_v21 = vsub.f32 %v758_v36, %v144_v42  ;;  %280 = vadd.xlane.f32.xlu1 %v279_v8 }
  0x88   :  { %v1011_v14 = vsub.f32 %v715_v24, %v134_v2  ;;  %v1014_v15 = vsub.f32 %v720_v25, %v134_v2  ;;  %v205_v23 = vmul.f32 %v999_v9, %v999_v9  ;;  %v206_v24 = vmul.f32 %v1002_v10, %v1002_v10 }
  0x89   :  { %1577 = vst [vmem:[#allocation14_spill] sm:$0xff] %v1017_v7  ;;  %v231_v25 = vmul.f32 %v1005_v13, %v1005_v13  ;;  %v232_v31 = vmul.f32 %v1008_v0, %v1008_v0  ;;  %v1037_v34 = vsub.f32 %v729_v29, %v134_v2  ;;  %v1040_v35 = vsub.f32 %v734_v30, %v134_v2 }
  0x8a   :  { %1575 = vst [vmem:[#allocation12_spill] sm:$0xff] %v1011_v14  ;;  %v201_v36 = vmul.f32 %v1011_v14, %v1011_v14  ;;  %v202_v4 = vmul.f32 %v1014_v15, %v1014_v15  ;;  %v114_v61 = vpop.xlane.xlu2 %113  ;;  %v255_v41 = vadd.f32 %v229_v6, %v203_v28  ;;  %v256_v43 = vadd.f32 %v230_v3, %v204_v1 }
  0x8b   :  { %1576 = vst [vmem:[#allocation13_spill] sm:$0xff] %v1014_v15  ;;  %v257_v11 = vadd.f32 %v231_v25, %v205_v23  ;;  %v258_v18 = vadd.f32 %v232_v31, %v206_v24  ;;  %v139_v47 = vmul.f32 0.001953125, %v114_v61  ;;  %v227_v29 = vmul.f32 %v1037_v34, %v1037_v34 }
  0x8c   :  { %1578 = vst [vmem:[#allocation15_spill] sm:$0xff] %v1020_v19  ;;  %v111_v48 = vpop.xlane.xlu1 %110  ;;  %v228_v30 = vmul.f32 %v1040_v35, %v1040_v35  ;;  %v1052_v2 = vmul.f32 %v1017_v7, %v1017_v7  ;;  %v108_v8 = vpop.xlane.xlu0 %107  ;;  %v288_v14 = vadd.f32 %v256_v43, %v255_v41  ;;  %v1056_v28 = vmul.f32 %v1020_v19, %v1020_v19 }
  0x8d   :  { %1579 = vst [vmem:[#allocation16_spill] sm:$0xff] %v1023_v20  ;;  %v138_v42 = vmul.f32 0.001953125, %v111_v48  ;;  %v291_v15 = vadd.f32 %v258_v18, %v257_v11  ;;  %v137_v1 = vmul.f32 0.001953125, %v108_v8  ;;  %v253_v6 = vadd.f32 %v227_v29, %v201_v36 }
  0x8e   :  { %1580 = vst [vmem:[#allocation17_spill] sm:$0xff] %v1026_v21  ;;  %v254_v3 = vadd.f32 %v228_v30, %v202_v4  ;;  %v1059_v23 = vsub.f32 %v771_v44, %v139_v47  ;;  %v1062_v24 = vsub.f32 %v776_v45, %v139_v47  ;;  %v1065_v25 = vsub.f32 %v781_v46, %v139_v47 }
  0x8f   :  { %292 = vadd.xlane.f32.xlu2 %v291_v15  ;;  %v1068_v31 = vsub.f32 %v787_v49, %v139_v47  ;;  %v1071_v61 = vsub.f32 %v792_v50, %v138_v42  ;;  %289 = vadd.xlane.f32.xlu1 %v288_v14  ;;  %v1076_v44 = vsub.f32 %v797_v51, %v138_v42 }
  0x90   :  { %v285_v11 = vadd.f32 %v254_v3, %v253_v6  ;;  %v211_v36 = vmul.f32 %v1059_v23, %v1059_v23  ;;  %v1079_v45 = vsub.f32 %v803_v53, %v138_v42  ;;  %v212_v46 = vmul.f32 %v1062_v24, %v1062_v24 }
  0x91   :  { %v237_v49 = vmul.f32 %v1065_v25, %v1065_v25  ;;  %v238_v50 = vmul.f32 %v1068_v31, %v1068_v31  ;;  %v1088_v14 = vsub.f32 %v808_v54, %v138_v42  ;;  %v209_v51 = vmul.f32 %v1071_v61, %v1071_v61 }
  0x92   :  { %286 = vadd.xlane.f32.xlu0 %v285_v11  ;;  %v210_v53 = vmul.f32 %v1076_v44, %v1076_v44  ;;  %v235_v15 = vmul.f32 %v1079_v45, %v1079_v45  ;;  %v1097_v4 = vsub.f32 %v813_v55, %v137_v1  ;;  %v123_v18 = vpop.xlane.xlu2 %122  ;;  %v1102_v47 = vsub.f32 %v818_v57, %v137_v1 }
  0x93   :  { %v263_v41 = vadd.f32 %v237_v49, %v211_v36  ;;  %v264_v43 = vadd.f32 %v238_v50, %v212_v46  ;;  %v236_v54 = vmul.f32 %v1088_v14, %v1088_v14  ;;  %v142_v48 = vmul.f32 0.001953125, %v123_v18 }
  0x94   :  { %v120_v29 = vpop.xlane.xlu1 %119  ;;  %v261_v30 = vadd.f32 %v235_v15, %v209_v51  ;;  %v1105_v42 = vsub.f32 %v823_v58, %v137_v1  ;;  %v1108_v8 = vsub.f32 %v828_v59, %v137_v1  ;;  %v117_v6 = vpop.xlane.xlu0 %116  ;;  %v207_v36 = vmul.f32 %v1097_v4, %v1097_v4 }
  0x95   :  { %v141_v55 = vmul.f32 0.001953125, %v120_v29  ;;  %v300_v3 = vadd.f32 %v264_v43, %v263_v41  ;;  %v262_v11 = vadd.f32 %v236_v54, %v210_v53  ;;  %v140_v46 = vmul.f32 0.001953125, %v117_v6 }
  0x96   :  { %v208_v57 = vmul.f32 %v1102_v47, %v1102_v47  ;;  %v233_v49 = vmul.f32 %v1105_v42, %v1105_v42  ;;  %v234_v58 = vmul.f32 %v1108_v8, %v1108_v8  ;;  %v1119_v1 = vsub.f32 %v845_v12, %v142_v48 }
  0x97   :  { %301 = vadd.xlane.f32.xlu2 %v300_v3  ;;  %v297_v59 = vadd.f32 %v262_v11, %v261_v30  ;;  %v1122_v50 = vsub.f32 %v850_v16, %v142_v48  ;;  %v1125_v51 = vsub.f32 %v855_v17, %v142_v48  ;;  %v1128_v18 = vsub.f32 %v860_v22, %v142_v48 }
  0x98   :  { %v259_v53 = vadd.f32 %v233_v49, %v207_v36  ;;  %v260_v15 = vadd.f32 %v234_v58, %v208_v57  ;;  %v1131_v41 = vsub.f32 %v865_v26, %v141_v55  ;;  %v217_v43 = vmul.f32 %v1119_v1, %v1119_v1  ;;  %v1581_v57 = vld [vmem:[#allocation2_spill] sm:$0xff] }
  0x99   :  { %298 = vadd.xlane.f32.xlu1 %v297_v59  ;;  %v218_v12 = vmul.f32 %v1122_v50, %v1122_v50  ;;  %v243_v16 = vmul.f32 %v1125_v51, %v1125_v51  ;;  %v1140_v17 = vsub.f32 %v870_v27, %v141_v55  ;;  %v244_v22 = vmul.f32 %v1128_v18, %v1128_v18 }
  0x9a   :  { %v294_v54 = vadd.f32 %v260_v15, %v259_v53  ;;  %v1145_v26 = vsub.f32 %v875_v32, %v141_v55  ;;  %v1148_v48 = vsub.f32 %v880_v33, %v141_v55  ;;  %v215_v30 = vmul.f32 %v1131_v41, %v1131_v41 }
  0x9b   :  { %v269_v29 = vadd.f32 %v243_v16, %v217_v43  ;;  %v216_v6 = vmul.f32 %v1140_v17, %v1140_v17  ;;  %v1155_v27 = vsub.f32 %v885_v37, %v140_v46  ;;  %v270_v3 = vadd.f32 %v244_v22, %v218_v12 }
  0x9c   :  { %295 = vadd.xlane.f32.xlu0 %v294_v54  ;;  %v241_v11 = vmul.f32 %v1145_v26, %v1145_v26  ;;  %v242_v32 = vmul.f32 %v1148_v48, %v1148_v48  ;;  %v1162_v33 = vsub.f32 %v890_v38, %v140_v46  ;;  %v126_v55 = vpop.xlane.xlu0 %125  ;;  %v1165_v36 = vsub.f32 %v895_v39, %v140_v46 }
  0x9d   :  { %v1168_v49 = vsub.f32 %v1581_v57, %v140_v46  ;;  %v213_v37 = vmul.f32 %v1155_v27, %v1155_v27  ;;  %v247_v58 = vmul.f32 %v1023_v20, %v1023_v20  ;;  %v143_v59 = vmul.f32 0.001953125, %v126_v55 }
  0x9e   :  { %v309_v53 = vadd.f32 %v270_v3, %v269_v29  ;;  %v267_v15 = vadd.f32 %v241_v11, %v215_v30  ;;  %v268_v43 = vadd.f32 %v242_v32, %v216_v6  ;;  %v214_v38 = vmul.f32 %v1162_v33, %v1162_v33 }
  0x9f   :  { %v239_v39 = vmul.f32 %v1165_v36, %v1165_v36  ;;  %v240_v46 = vmul.f32 %v1168_v49, %v1168_v49  ;;  %v248_v12 = vmul.f32 %v1026_v21, %v1026_v21  ;;  %v273_v54 = vsel %vm84_vm0, %v1052_v2, 0.0  ;;  %v1591_v21 = vld [vmem:[#allocation8_spill] sm:$0xff] }
  0xa0   :  { %310 = vadd.xlane.f32.xlu2 %v309_v53  ;;  %v306_v16 = vadd.f32 %v268_v43, %v267_v15  ;;  %v274_v22 = vsel %vm84_vm0, %v247_v58, 0.0  ;;  %v276_v29 = vsel %vm84_vm0, %v1056_v28, 0.0  ;;  %v1189_v55 = vsub.f32 %v917_v62, %v143_v59  ;;  %v1584_v53 = vld [vmem:[#allocation3_spill] sm:$0xff]  ;;  %v1586_v15 = vld [vmem:[#allocation4_spill] sm:$0xff] }
  0xa1   :  { %v265_v30 = vadd.f32 %v239_v39, %v213_v37  ;;  %v266_v6 = vadd.f32 %v240_v46, %v214_v38  ;;  %v275_v3 = vadd.f32 %v274_v22, %v273_v54  ;;  %v277_v11 = vsel %vm84_vm0, %v248_v12, 0.0 }
  0xa2   :  { %307 = vadd.xlane.f32.xlu1 %v306_v16  ;;  %v278_v32 = vadd.f32 %v277_v11, %v276_v29  ;;  %1582 = vst [vmem:[#allocation2_spill] sm:$0xff] %v1189_v55  ;;  %v1192_v57 = vsub.f32 %v922_v63, %v143_v59  ;;  %v1195_v2 = vsub.f32 %v1584_v53, %v143_v59 }
  0xa3   :  { %v303_v58 = vadd.f32 %v266_v6, %v265_v30  ;;  %v1198_v43 = vsub.f32 %v1586_v15, %v143_v59  ;;  %v219_v28 = vmul.f32 %v1189_v55, %v1189_v55  ;;  %v315_v63 = vsel %vm84_vm0, %v275_v3, 0.0 }
  0xa4   :  { %1583 = vst [vmem:[#allocation18_spill] sm:$0xff] %v1192_v57  ;;  %v220_v37 = vmul.f32 %v1192_v57, %v1192_v57  ;;  %v245_v62 = vmul.f32 %v1195_v2, %v1195_v2  ;;  %v316_v38 = vsel %vm84_vm0, %v278_v32, 0.0  ;;  %v1590_v57 = vld [vmem:[#allocation7_spill] sm:$0xff] }
  0xa5   :  { %1585 = vst [vmem:[#allocation3_spill] sm:$0xff] %v1195_v2  ;;  %304 = vadd.xlane.f32.xlu0 %v303_v58  ;;  %v246_v39 = vmul.f32 %v1198_v43, %v1198_v43  ;;  %v317_v12 = vadd.f32 %v316_v38, %v315_v63  ;;  %v1589_v2 = vld [vmem:[#allocation6_spill] sm:$0xff] }
  0xa6   :  { %1587 = vst [vmem:[#allocation4_spill] sm:$0xff] %v1198_v43  ;;  %v271_v46 = vadd.f32 %v245_v62, %v219_v28 }
  0xa7   :  { %v272_v59 = vadd.f32 %v246_v39, %v220_v37 }
  0xa9   :  { %v312_v16 = vadd.f32 %v272_v59, %v271_v46 }
  0xaa   :  { %318 = vadd.xlane.f32.xlu1 %v317_v12 }
  0xad   :  { %313 = vadd.xlane.f32.xlu0 %v312_v16 }
  0xf9   :  { %v284_v54 = vpop.xlane.xlu2 %283 }
  0xfa   :  { %v321_v22 = vmul.f32 0.001953125, %v284_v54  ;;  %v281_v29 = vpop.xlane.xlu1 %280 }
  0xfb   :  { %v320_v30 = vmul.f32 0.001953125, %v281_v29 }
  0xfc   :  { %v334_v6 = vadd.f32 1e-05, %v321_v22 }
  0xfd   :  { %v333_v11 = vadd.f32 1e-05, %v320_v30 }
  0xfe   :  { %584 = vrsqrt.f32 %v334_v6  ;;  %vm362_vm2 = vweird.f32 %v334_v6 }
  0xff   :  { %586 = vrsqrt.f32 %v333_v11  ;;  %vm352_vm3 = vweird.f32 %v333_v11 }
 0x102   :  { %v293_v3 = vpop.xlane.xlu2 %292  ;;  %v290_v32 = vpop.xlane.xlu1 %289 }
 0x103   :  { %v324_v53 = vmul.f32 0.001953125, %v293_v3  ;;  %v323_v58 = vmul.f32 0.001953125, %v290_v32 }
 0x104   :  { %v585_v15 = vpop.eup %584 }
 0x105   :  { %v1210_v43 = vadd.f32 1e-05, %v324_v53  ;;  %v287_v28 = vpop.xlane.xlu0 %286  ;;  %v587_v37 = vpop.eup %586  ;;  %v357_v62 = vmul.f32 %v585_v15, %v334_v6  ;;  %v1212_v63 = vadd.f32 1e-05, %v323_v58  ;;  %vm363_vm1 = vweird.f32 %v585_v15 }
 0x106   :  { %v322_v38 = vmul.f32 0.001953125, %v287_v28  ;;  %v347_v39 = vmul.f32 %v587_v37, %v333_v11  ;;  %vm353_vm4 = vweird.f32 %v587_v37  ;;  %vm364_vm5 = vmor %vm362_vm2, %vm363_vm1  ;;  %v1594_v11 = vld [vmem:[#allocation11_spill] sm:$0xff] }
 0x107   :  { %588 = vrsqrt.f32 %v1210_v43  ;;  %v358_v46 = vmul.f32 %v585_v15, %v357_v62  ;;  %vm392_vm6 = vweird.f32 %v1210_v43  ;;  %vm382_vm7 = vweird.f32 %v1212_v63  ;;  %vm354_vm8 = vmor %vm352_vm3, %vm353_vm4 }
 0x108   :  { %590 = vrsqrt.f32 %v1212_v63  ;;  %v1216_v59 = vadd.f32 1e-05, %v322_v38  ;;  %v348_v12 = vmul.f32 %v587_v37, %v347_v39 }
 0x109   :  { %v359_v16 = vmul.f32 0.5, %v358_v46 }
 0x10a   :  { %592 = vrsqrt.f32 %v1216_v59  ;;  %v302_v54 = vpop.xlane.xlu2 %301  ;;  %v349_v22 = vmul.f32 0.5, %v348_v12  ;;  %vm372_vm12 = vweird.f32 %v1216_v59 }
 0x10b   :  { %v327_v29 = vmul.f32 0.001953125, %v302_v54  ;;  %v360_v30 = vsub.f32 1.5, %v359_v16 }
 0x10c   :  { %v299_v3 = vpop.xlane.xlu1 %298  ;;  %v350_v32 = vsub.f32 1.5, %v349_v22 }
 0x10d   :  { %v589_v53 = vpop.eup %588  ;;  %v1219_v58 = vadd.f32 1e-05, %v327_v29  ;;  %v326_v28 = vmul.f32 0.001953125, %v299_v3  ;;  %v361_v38 = vmul.f32 %v585_v15, %v360_v30  ;;  %v1588_v30 = vld [vmem:[#allocation5_spill] sm:$0xff] }
 0x10e   :  { %v1221_v62 = vpop.eup %590  ;;  %v387_v39 = vmul.f32 %v589_v53, %v1210_v43  ;;  %v351_v46 = vmul.f32 %v587_v37, %v350_v32  ;;  %vm393_vm9 = vweird.f32 %v589_v53 }
 0x10f   :  { %v377_v12 = vmul.f32 %v1221_v62, %v1212_v63  ;;  %594 = vrsqrt.f32 %v1219_v58  ;;  %v296_v6 = vpop.xlane.xlu0 %295  ;;  %v365_v54 = vsel %vm364_vm5, %v585_v15, %v361_v38  ;;  %v1231_v29 = vadd.f32 1e-05, %v326_v28  ;;  %v1592_v28 = vld [vmem:[#allocation9_spill] sm:$0xff]  ;;  %vm394_vm11 = vmor %vm392_vm6, %vm393_vm9 }
 0x110   :  { %v1228_v16 = vpop.eup %592  ;;  %v388_v22 = vmul.f32 %v589_v53, %v387_v39  ;;  %v478_v3 = vmul.f32 %v365_v54, %v1588_v30  ;;  %v479_v32 = vmul.f32 %v365_v54, %v1589_v2  ;;  %v504_v55 = vmul.f32 %v365_v54, %v1590_v57  ;;  %v1593_v39 = vld [vmem:[#allocation10_spill] sm:$0xff] }
 0x111   :  { %v505_v20 = vmul.f32 %v365_v54, %v1591_v21  ;;  %v355_v19 = vsel %vm354_vm8, %v587_v37, %v351_v46  ;;  %v378_v15 = vmul.f32 %v1221_v62, %v377_v12  ;;  %v367_v38 = vmul.f32 %v1228_v16, %v1216_v59 }
 0x112   :  { %v389_v7 = vmul.f32 0.5, %v388_v22  ;;  %530 = vst [vmem:[%s1544_s1 + $0x10] sm:$0xff] %v478_v3  ;;  %v476_v2 = vmul.f32 %v355_v19, %v1592_v28  ;;  %v477_v57 = vmul.f32 %v355_v19, %v1593_v39  ;;  %vm383_vm10 = vweird.f32 %v1221_v62 }
 0x113   :  { %v311_v21 = vpop.xlane.xlu2 %310  ;;  %531 = vst [vmem:[%s1544_s1 + $0x18] sm:$0xff] %v479_v32  ;;  %v502_v37 = vmul.f32 %v355_v19, %v1594_v11  ;;  %v379_v12 = vmul.f32 0.5, %v378_v15  ;;  %v368_v54 = vmul.f32 %v1228_v16, %v367_v38  ;;  %v503_v30 = vmul.f32 %v355_v19, %v969_v5  ;;  %vm384_vm14 = vmor %vm382_vm7, %vm383_vm10 }
 0x114   :  { %v390_v46 = vsub.f32 1.5, %v389_v7  ;;  %556 = vst [vmem:[%s1544_s1 + $0xe0] sm:$0xff] %v504_v55  ;;  %596 = vrsqrt.f32 %v1231_v29  ;;  %v325_v3 = vmul.f32 0.001953125, %v296_v6  ;;  %v330_v28 = vmul.f32 0.001953125, %v311_v21 }
 0x115   :  { %v1253_v22 = vpop.eup %594  ;;  %v308_v39 = vpop.xlane.xlu1 %307  ;;  %557 = vst [vmem:[%s1544_s1 + $0xe8] sm:$0xff] %v505_v20  ;;  %v380_v32 = vsub.f32 1.5, %v379_v12  ;;  %v369_v15 = vmul.f32 0.5, %v368_v54  ;;  %vm373_vm13 = vweird.f32 %v1228_v16  ;;  %vm422_vm0 = vweird.f32 %v1219_v58 }
 0x116   :  { %v391_v7 = vmul.f32 %v589_v53, %v390_v46  ;;  %v417_v38 = vmul.f32 %v1253_v22, %v1219_v58  ;;  %528 = vst [vmem:[%s1544_s1] sm:$0xff] %v476_v2  ;;  %v1273_v5 = vadd.f32 1e-05, %v325_v3  ;;  %v1275_v19 = vadd.f32 1e-05, %v330_v28  ;;  %vm374_vm15 = vmor %vm372_vm12, %vm373_vm13 }
 0x117   :  { %529 = vst [vmem:[%s1544_s1 + $0x8] sm:$0xff] %v477_v57  ;;  %v381_v55 = vmul.f32 %v1221_v62, %v380_v32  ;;  %v370_v6 = vsub.f32 1.5, %v369_v15  ;;  %vm423_vm1 = vweird.f32 %v1253_v22  ;;  %v1596_v32 = vld [vmem:[#allocation13_spill] sm:$0xff]  ;;  %vm412_vm4 = vweird.f32 %v1231_v29 }
 0x118   :  { %v395_v20 = vsel %vm394_vm11, %v589_v53, %v391_v7  ;;  %v418_v2 = vmul.f32 %v1253_v22, %v417_v38  ;;  %v305_v43 = vpop.xlane.xlu0 %304  ;;  %554 = vst [vmem:[%s1544_s1 + $0xd0] sm:$0xff] %v502_v37  ;;  %598 = vrsqrt.f32 %v1273_v5  ;;  %vm424_vm2 = vmor %vm422_vm0, %vm423_vm1  ;;  %vm402_vm7 = vweird.f32 %v1273_v5 }
 0x119   :  { %v484_v21 = vmul.f32 %v395_v20, %v999_v9  ;;  %v485_v11 = vmul.f32 %v395_v20, %v1002_v10  ;;  %v510_v46 = vmul.f32 %v395_v20, %v1005_v13  ;;  %v511_v12 = vmul.f32 %v395_v20, %v1008_v0  ;;  %555 = vst [vmem:[%s1544_s1 + $0xd8] sm:$0xff] %v503_v30 }
 0x11a   :  { %v385_v53 = vsel %vm384_vm14, %v1221_v62, %v381_v55  ;;  %v371_v57 = vmul.f32 %v1228_v16, %v370_v6  ;;  %v419_v9 = vmul.f32 0.5, %v418_v2  ;;  %v597_v10 = vpop.eup %596  ;;  %v329_v0 = vmul.f32 0.001953125, %v308_v39 }
 0x11b   :  { %536 = vst [vmem:[%s1544_s1 + $0x40] sm:$0xff] %v484_v21  ;;  %v482_v13 = vmul.f32 %v385_v53, %v939_v40  ;;  %v483_v63 = vmul.f32 %v385_v53, %v942_v56  ;;  %v407_v40 = vmul.f32 %v597_v10, %v1231_v29  ;;  %v508_v59 = vmul.f32 %v385_v53, %v945_v60 }
 0x11c   :  { %537 = vst [vmem:[%s1544_s1 + $0x48] sm:$0xff] %v485_v11  ;;  %v375_v62 = vsel %vm374_vm15, %v1228_v16, %v371_v57  ;;  %v420_v37 = vsub.f32 1.5, %v419_v9  ;;  %v509_v30 = vmul.f32 %v385_v53, %v988_v52  ;;  %600 = vrsqrt.f32 %v1275_v19  ;;  %v1595_v16 = vld [vmem:[#allocation12_spill] sm:$0xff] }
 0x11d   :  { %562 = vst [vmem:[%s1544_s1 + $0x110] sm:$0xff] %v510_v46  ;;  %v319_v54 = vpop.xlane.xlu1 %318  ;;  %v408_v3 = vmul.f32 %v597_v10, %v407_v40  ;;  %v480_v28 = vmul.f32 %v375_v62, %v1595_v16  ;;  %v1333_v60 = vadd.f32 1e-05, %v329_v0  ;;  %v328_v39 = vmul.f32 0.001953125, %v305_v43 }
 0x11e   :  { %563 = vst [vmem:[%s1544_s1 + $0x118] sm:$0xff] %v511_v12  ;;  %v421_v56 = vmul.f32 %v1253_v22, %v420_v37  ;;  %v332_v52 = vmul.f32 0.001953125, %v319_v54  ;;  %v599_v7 = vpop.eup %598  ;;  %v481_v15 = vmul.f32 %v375_v62, %v1596_v32  ;;  %v506_v58 = vmul.f32 %v375_v62, %v1037_v34 }
 0x11f   :  { %534 = vst [vmem:[%s1544_s1 + $0x30] sm:$0xff] %v482_v13  ;;  %v409_v20 = vmul.f32 0.5, %v408_v3  ;;  %vm413_vm3 = vweird.f32 %v597_v10  ;;  %v507_v6 = vmul.f32 %v375_v62, %v1040_v35  ;;  %v397_v43 = vmul.f32 %v599_v7, %v1273_v5 }
 0x120   :  { %535 = vst [vmem:[%s1544_s1 + $0x38] sm:$0xff] %v483_v63  ;;  %v425_v38 = vsel %vm424_vm2, %v1253_v22, %v421_v56  ;;  %v314_v55 = vpop.xlane.xlu0 %313  ;;  %602 = vrsqrt.f32 %v1333_v60  ;;  %v1355_v34 = vadd.f32 1e-05, %v328_v39  ;;  %v1357_v21 = vadd.f32 1e-05, %v332_v52  ;;  %vm414_vm5 = vmor %vm412_vm4, %vm413_vm3 }
 0x121   :  { %560 = vst [vmem:[%s1544_s1 + $0x100] sm:$0xff] %v508_v59  ;;  %v410_v2 = vsub.f32 1.5, %v409_v20  ;;  %v490_v22 = vmul.f32 %v425_v38, %v1059_v23  ;;  %v491_v35 = vmul.f32 %v425_v38, %v1062_v24  ;;  %v398_v12 = vmul.f32 %v599_v7, %v397_v43 }
 0x122   :  { %561 = vst [vmem:[%s1544_s1 + $0x108] sm:$0xff] %v509_v30  ;;  %v1359_v11 = vpop.eup %600  ;;  %v331_v53 = vmul.f32 0.001953125, %v314_v55  ;;  %v516_v23 = vmul.f32 %v425_v38, %v1065_v25  ;;  %604 = vrsqrt.f32 %v1355_v34  ;;  %v517_v24 = vmul.f32 %v425_v38, %v1068_v31 }
 0x123   :  { %532 = vst [vmem:[%s1544_s1 + $0x20] sm:$0xff] %v480_v28  ;;  %v411_v46 = vmul.f32 %v597_v10, %v410_v2  ;;  %v447_v29 = vmul.f32 %v1359_v11, %v1275_v19  ;;  %v399_v9 = vmul.f32 0.5, %v398_v12  ;;  %606 = vrsqrt.f32 %v1357_v21 }
 0x124   :  { %533 = vst [vmem:[%s1544_s1 + $0x28] sm:$0xff] %v481_v15  ;;  %vm403_vm6 = vweird.f32 %v599_v7  ;;  %v1389_v63 = vadd.f32 1e-05, %v331_v53  ;;  %vm452_vm9 = vweird.f32 %v1275_v19  ;;  %vm453_vm10 = vweird.f32 %v1359_v11 }
 0x125   :  { %558 = vst [vmem:[%s1544_s1 + $0xf0] sm:$0xff] %v506_v58  ;;  %v415_v57 = vsel %vm414_vm5, %v597_v10, %v411_v46  ;;  %v400_v31 = vsub.f32 1.5, %v399_v9  ;;  %v448_v10 = vmul.f32 %v1359_v11, %v447_v29  ;;  %vm404_vm8 = vmor %vm402_vm7, %vm403_vm6  ;;  %vm442_vm12 = vweird.f32 %v1333_v60  ;;  %v1600_v9 = vld [vmem:[#allocation17_spill] sm:$0xff] }
 0x126   :  { %559 = vst [vmem:[%s1544_s1 + $0xf8] sm:$0xff] %v507_v6  ;;  %v488_v25 = vmul.f32 %v415_v57, %v1071_v61  ;;  %v1382_v13 = vpop.eup %602  ;;  %v489_v0 = vmul.f32 %v415_v57, %v1076_v44  ;;  %v514_v61 = vmul.f32 %v415_v57, %v1079_v45  ;;  %v515_v44 = vmul.f32 %v415_v57, %v1088_v14  ;;  %vm454_vm11 = vmor %vm452_vm9, %vm453_vm10 }
 0x127   :  { %542 = vst [vmem:[%s1544_s1 + $0x70] sm:$0xff] %v490_v22  ;;  %v437_v62 = vmul.f32 %v1382_v13, %v1333_v60  ;;  %v401_v37 = vmul.f32 %v599_v7, %v400_v31  ;;  %v449_v40 = vmul.f32 0.5, %v448_v10  ;;  %608 = vrsqrt.f32 %v1389_v63  ;;  %v1602_v31 = vld [vmem:[#allocation18_spill] sm:$0xff] }
 0x128   :  { %543 = vst [vmem:[%s1544_s1 + $0x78] sm:$0xff] %v491_v35  ;;  %v605_v59 = vpop.eup %604  ;;  %vm443_vm13 = vweird.f32 %v1382_v13  ;;  %vm432_vm0 = vweird.f32 %v1355_v34  ;;  %vm472_vm3 = vweird.f32 %v1357_v21  ;;  %vm462_vm6 = vweird.f32 %v1389_v63 }
 0x129   :  { %568 = vst [vmem:[%s1544_s1 + $0x140] sm:$0xff] %v516_v23  ;;  %v438_v45 = vmul.f32 %v1382_v13, %v437_v62  ;;  %v1409_v5 = vpop.eup %606  ;;  %v405_v14 = vsel %vm404_vm8, %v599_v7, %v401_v37  ;;  %v450_v54 = vsub.f32 1.5, %v449_v40  ;;  %v427_v30 = vmul.f32 %v605_v59, %v1355_v34  ;;  %vm444_vm15 = vmor %vm442_vm12, %vm443_vm13  ;;  %v1604_v62 = vld [vmem:[#allocation4_spill] sm:$0xff] }
 0x12a   :  { %569 = vst [vmem:[%s1544_s1 + $0x148] sm:$0xff] %v517_v24  ;;  %v486_v56 = vmul.f32 %v405_v14, %v1097_v4  ;;  %v487_v3 = vmul.f32 %v405_v14, %v1102_v47  ;;  %v512_v16 = vmul.f32 %v405_v14, %v1105_v42  ;;  %v513_v28 = vmul.f32 %v405_v14, %v1108_v8 }
 0x12b   :  { %540 = vst [vmem:[%s1544_s1 + $0x60] sm:$0xff] %v488_v25  ;;  %v451_v39 = vmul.f32 %v1359_v11, %v450_v54  ;;  %v439_v52 = vmul.f32 0.5, %v438_v45  ;;  %v428_v7 = vmul.f32 %v605_v59, %v427_v30  ;;  %v467_v32 = vmul.f32 %v1409_v5, %v1357_v21 }
 0x12c   :  { %541 = vst [vmem:[%s1544_s1 + $0x68] sm:$0xff] %v489_v0  ;;  %vm433_vm14 = vweird.f32 %v605_v59  ;;  %vm473_vm1 = vweird.f32 %v1409_v5 }
 0x12d   :  { %566 = vst [vmem:[%s1544_s1 + $0x130] sm:$0xff] %v514_v61  ;;  %v609_v4 = vpop.eup %608  ;;  %v455_v47 = vsel %vm454_vm11, %v1359_v11, %v451_v39  ;;  %v440_v42 = vsub.f32 1.5, %v439_v52  ;;  %v429_v8 = vmul.f32 0.5, %v428_v7  ;;  %v468_v15 = vmul.f32 %v1409_v5, %v467_v32  ;;  %vm434_vm2 = vmor %vm432_vm0, %vm433_vm14 }
 0x12e   :  { %567 = vst [vmem:[%s1544_s1 + $0x138] sm:$0xff] %v515_v44  ;;  %v496_v19 = vmul.f32 %v455_v47, %v1119_v1  ;;  %v497_v38 = vmul.f32 %v455_v47, %v1122_v50  ;;  %v522_v20 = vmul.f32 %v455_v47, %v1125_v51  ;;  %v523_v58 = vmul.f32 %v455_v47, %v1128_v18  ;;  %vm474_vm4 = vmor %vm472_vm3, %vm473_vm1 }
 0x12f   :  { %538 = vst [vmem:[%s1544_s1 + $0x50] sm:$0xff] %v486_v56  ;;  %v441_v55 = vmul.f32 %v1382_v13, %v440_v42  ;;  %v430_v6 = vsub.f32 1.5, %v429_v8  ;;  %v469_v2 = vmul.f32 0.5, %v468_v15  ;;  %v457_v43 = vmul.f32 %v609_v4, %v1389_v63  ;;  %v1603_v63 = vld [vmem:[#allocation3_spill] sm:$0xff] }
 0x130   :  { %539 = vst [vmem:[%s1544_s1 + $0x58] sm:$0xff] %v487_v3  ;;  %vm463_vm5 = vweird.f32 %v609_v4 }
 0x131   :  { %564 = vst [vmem:[%s1544_s1 + $0x120] sm:$0xff] %v512_v16  ;;  %v445_v1 = vsel %vm444_vm15, %v1382_v13, %v441_v55  ;;  %v431_v50 = vmul.f32 %v605_v59, %v430_v6  ;;  %v470_v51 = vsub.f32 1.5, %v469_v2  ;;  %v458_v18 = vmul.f32 %v609_v4, %v457_v43  ;;  %vm464_vm7 = vmor %vm462_vm6, %vm463_vm5  ;;  %v1601_v13 = vld [vmem:[#allocation2_spill] sm:$0xff] }
 0x132   :  { %565 = vst [vmem:[%s1544_s1 + $0x128] sm:$0xff] %v513_v28  ;;  %v494_v60 = vmul.f32 %v445_v1, %v1131_v41  ;;  %v495_v22 = vmul.f32 %v445_v1, %v1140_v17  ;;  %v520_v34 = vmul.f32 %v445_v1, %v1145_v26  ;;  %v521_v11 = vmul.f32 %v445_v1, %v1148_v48 }
 0x133   :  { %548 = vst [vmem:[%s1544_s1 + $0xa0] sm:$0xff] %v496_v19  ;;  %v435_v35 = vsel %vm434_vm2, %v605_v59, %v431_v50  ;;  %v471_v46 = vmul.f32 %v1409_v5, %v470_v51  ;;  %v459_v12 = vmul.f32 0.5, %v458_v18 }
 0x134   :  { %549 = vst [vmem:[%s1544_s1 + $0xa8] sm:$0xff] %v497_v38  ;;  %v492_v41 = vmul.f32 %v435_v35, %v1155_v27  ;;  %v493_v17 = vmul.f32 %v435_v35, %v1162_v33  ;;  %v518_v21 = vmul.f32 %v435_v35, %v1165_v36  ;;  %v519_v27 = vmul.f32 %v435_v35, %v1168_v49  ;;  %v1597_v33 = vld [vmem:[#allocation14_spill] sm:$0xff]  ;;  %v1598_v36 = vld [vmem:[#allocation15_spill] sm:$0xff]  ;;  %v1599_v49 = vld [vmem:[#allocation16_spill] sm:$0xff] }
 0x135   :  { %574 = vst [vmem:[%s1544_s1 + $0x170] sm:$0xff] %v522_v20  ;;  %v475_v26 = vsel %vm474_vm4, %v1409_v5, %v471_v46  ;;  %v460_v48 = vsub.f32 1.5, %v459_v12 }
 0x136   :  { %575 = vst [vmem:[%s1544_s1 + $0x178] sm:$0xff] %v523_v58  ;;  %v500_v23 = vmul.f32 %v475_v26, %v1597_v33  ;;  %v501_v29 = vmul.f32 %v475_v26, %v1598_v36  ;;  %v526_v57 = vmul.f32 %v475_v26, %v1599_v49  ;;  %v527_v25 = vmul.f32 %v475_v26, %v1600_v9 }
 0x137   :  { %546 = vst [vmem:[%s1544_s1 + $0x90] sm:$0xff] %v494_v60  ;;  %v461_v53 = vmul.f32 %v609_v4, %v460_v48 }
 0x138   :  { %547 = vst [vmem:[%s1544_s1 + $0x98] sm:$0xff] %v495_v22 }
 0x139   :  { %572 = vst [vmem:[%s1544_s1 + $0x160] sm:$0xff] %v520_v34  ;;  %v465_v24 = vsel %vm464_vm7, %v609_v4, %v461_v53 }
 0x13a   :  { %573 = vst [vmem:[%s1544_s1 + $0x168] sm:$0xff] %v521_v11  ;;  %v498_v0 = vmul.f32 %v465_v24, %v1601_v13  ;;  %v499_v10 = vmul.f32 %v465_v24, %v1602_v31  ;;  %v524_v61 = vmul.f32 %v465_v24, %v1603_v63  ;;  %v525_v44 = vmul.f32 %v465_v24, %v1604_v62 }
 0x13b   :  { %544 = vst [vmem:[%s1544_s1 + $0x80] sm:$0xff] %v492_v41 }
 0x13c   :  { %545 = vst [vmem:[%s1544_s1 + $0x88] sm:$0xff] %v493_v17 }
 0x13d   :  { %570 = vst [vmem:[%s1544_s1 + $0x150] sm:$0xff] %v518_v21 }
 0x13e   :  { %571 = vst [vmem:[%s1544_s1 + $0x158] sm:$0xff] %v519_v27 }
 0x13f   :  { %552 = vst [vmem:[%s1544_s1 + $0xc0] sm:$0xf] %v500_v23 }
 0x140   :  { %553 = vst [vmem:[%s1544_s1 + $0xc8] sm:$0xf] %v501_v29 }
 0x141   :  { %578 = vst [vmem:[%s1544_s1 + $0x190] sm:$0xf] %v526_v57 }
 0x142   :  { %579 = vst [vmem:[%s1544_s1 + $0x198] sm:$0xf] %v527_v25 }
 0x143   :  { %550 = vst [vmem:[%s1544_s1 + $0xb0] sm:$0xff] %v498_v0 }
 0x144   :  { %551 = vst [vmem:[%s1544_s1 + $0xb8] sm:$0xff] %v499_v10 }
 0x145   :  { %576 = vst [vmem:[%s1544_s1 + $0x180] sm:$0xff] %v524_v61 }
 0x146   :  { %577 = vst [vmem:[%s1544_s1 + $0x188] sm:$0xff] %v525_v44 }

</bundles_post_ra>
